<compile_context>
chip_gen: v6e
topology: v6e:2x2x1
jax: 0.10.0
libtpu: 0.0.40
codegen_flags: <defaults>
</compile_context>

<pallas_src>
import functools

import jax
import jax.numpy as jnp
import numpy as np
from jax.experimental import pallas as pl
from jax.experimental.pallas import tpu as pltpu


def _round_up(x, m):
    return (x + m - 1) // m * m


# ----------------------------------------------------------------------------
# Kernel
# ----------------------------------------------------------------------------
def _qnet_kernel(state_ref, w_ref, b_ref, q_ref, *, padded_state_size):
    S = padded_state_size

    x = state_ref[...].astype(jnp.bfloat16)                       # [tb, S_pad]

    # Layer 0: feature = relu(state @ W1 + b1).  S_pad is a multiple of 16,
    # so this row-slice of the bf16 weight slab is pack-aligned (clean,
    # unmasked MXU feed).  Padded state columns / weight rows are zero.
    h = jnp.dot(x, w_ref[0, :S, :], preferred_element_type=jnp.float32)
    h = jnp.maximum(h + b_ref[0:1, :], 0.0).astype(jnp.bfloat16)  # [tb, P]

    # Layer 1: fused value/advantage hidden = relu(h @ [Wv1 | Wa1] + [bv1|ba1]).
    h = jnp.dot(h, w_ref[1], preferred_element_type=jnp.float32)
    h = jnp.maximum(h + b_ref[1:2, :], 0.0).astype(jnp.bfloat16)  # [tb, P]

    # Layer 2: the dueling combine is pre-folded into the packed head weights
    # (see pack_params), so lanes 0..A-1 ARE the Q-values.  Epilogue is just
    # bias add + store: no cross-lane reduce, no reliance on padded lanes.
    q = jnp.dot(h, w_ref[2], preferred_element_type=jnp.float32) + b_ref[2:3, :]

    # TODO(synk): for a greedy-acting consumer, fuse argmax over lanes 0..A-1
    # here and emit int32 [tb, 1] actions instead of the [tb, P] slab.
    q_ref[...] = q.astype(q_ref.dtype)


# ----------------------------------------------------------------------------
# Host-side wrapper
# ----------------------------------------------------------------------------
def _choose_batch_tile(batch):
    """>=2 grid steps once the batch is big enough so the 'parallel' axis can
    shard across v7x's two TensorCores; 512-row tiles for large batches to
    amortize the ~0.35 us per-grid-step overhead."""
    if batch < 16:
        return batch                              # too small to split
    if batch <= 1024:
        return _round_up((batch + 1) // 2, 8)     # exactly 2 grid steps
    return 512


def qnetwork_forward(state, w_slab, b_slab, action_size,
                     out_dtype=jnp.bfloat16):
    """state: [B, S] float32. w_slab: [3, P, P] bf16. b_slab: [3, P] f32.

    Returns Q-values [B, action_size] in `out_dtype` (bf16 by default to
    halve output HBM traffic)."""
    B, S = state.shape
    P = w_slab.shape[-1]
    S_pad = _round_up(S, 16)                      # bf16 sublane-pack alignment

    tile_b = _choose_batch_tile(B)
    b_pad = _round_up(B, tile_b)
    if b_pad != B or S_pad != S:
        state = jnp.pad(state, ((0, b_pad - B), (0, S_pad - S)))

    kernel = functools.partial(_qnet_kernel, padded_state_size=S_pad)

    # Explicit VMEM budget: double-buffered tiles + slabs + slack.
    # NOTE(synk): at P=128 the weight slab is only 96 KiB so double-buffering
    # it is irrelevant; if hidden_size is scaled up, mark the weight/bias
    # specs pipeline_mode=pl.Buffered(1) (constant block index) to halve
    # resident weight VMEM on v7x's 64 MiB parts.
    out_itemsize = jnp.dtype(out_dtype).itemsize
    vmem_bytes = 2 * (w_slab.size * 2 + b_slab.size * 4
                      + tile_b * S_pad * 4 + tile_b * P * out_itemsize)
    vmem_limit = int(min(max(vmem_bytes + (4 << 20), 16 << 20), 100 << 20))

    out = pl.pallas_call(
        kernel,
        out_shape=jax.ShapeDtypeStruct((b_pad, P), out_dtype),
        grid=(b_pad // tile_b,),
        in_specs=[
            pl.BlockSpec((tile_b, S_pad), lambda i: (i, 0)),    # state tile
            pl.BlockSpec((3, P, P), lambda i: (0, 0, 0)),       # weight slab
            pl.BlockSpec((3, P), lambda i: (0, 0)),             # bias slab
        ],
        out_specs=pl.BlockSpec((tile_b, P), lambda i: (i, 0)),  # lane-dense
        compiler_params=pltpu.CompilerParams(
            dimension_semantics=("parallel",),                  # megacore-shardable
            vmem_limit_bytes=vmem_limit),
    )(state, w_slab, b_slab)

    return out[:B, :action_size]


# ----------------------------------------------------------------------------
# Parameter construction / packing
# ----------------------------------------------------------------------------
def init_params(key, state_size, action_size, hidden_size):
    """PyTorch-Linear-like init; weights stored transposed as [in, out]."""
    ks = jax.random.split(key, 10)

    def lin(kw, kb, fan_in, fan_out):
        bound = 1.0 / np.sqrt(fan_in)
        w = jax.random.uniform(kw, (fan_in, fan_out), jnp.float32, -bound, bound)
        b = jax.random.uniform(kb, (1, fan_out), jnp.float32, -bound, bound)
        return w, b

    w1, b1 = lin(ks[0], ks[1], state_size, hidden_size)
    wv1, bv1 = lin(ks[2], ks[3], hidden_size, hidden_size)
    wv2, bv2 = lin(ks[4], ks[5], hidden_size, 1)
    wa1, ba1 = lin(ks[6], ks[7], hidden_size, hidden_size)
    wa2, ba2 = lin(ks[8], ks[9], hidden_size, action_size)
    return dict(w1=w1, b1=b1, wv1=wv1, bv1=bv1, wv2=wv2, bv2=bv2,
                wa1=wa1, ba1=ba1, wa2=wa2, ba2=ba2)


def pack_params(p, state_size, action_size, hidden_size):
    """Pack all weights into one bf16 slab [3, P, P] and biases into [3, P].

    The dueling combine (value + advantage - mean(advantage)) is folded into
    the layer-2 columns, so lanes 0..A-1 of the head matmul hold Q directly."""
    S, A, H = state_size, action_size, hidden_size
    S_pad = _round_up(S, 16)
    lane_align = 256 if hidden_size >= 128 else 128   # v6e/v7x MXU is 256-wide
    P = _round_up(max(2 * H, A, S_pad), lane_align)

    w = np.zeros((3, P, P), np.float32)
    b = np.zeros((3, P), np.float32)

    # layer 0: feature
    w[0, :S, :H] = np.asarray(p["w1"])
    b[0, :H] = np.asarray(p["b1"])[0]
    # layer 1: fused hidden  [v_h | a_h]
    w[1, :H, :H] = np.asarray(p["wv1"])
    w[1, :H, H:2 * H] = np.asarray(p["wa1"])
    b[1, :H] = np.asarray(p["bv1"])[0]
    b[1, H:2 * H] = np.asarray(p["ba1"])[0]
    # layer 2: folded dueling head,  q_j = v + a_j - mean_k a_k
    wa2 = np.asarray(p["wa2"])                        # [H, A]
    wv2 = np.asarray(p["wv2"])[:, 0]                  # [H]
    ba2 = np.asarray(p["ba2"])[0]                     # [A]
    bv2 = np.asarray(p["bv2"])[0, 0]                  # scalar
    w[2, :H, :A] = wv2[:, None]                       # value, replicated per column
    w[2, H:2 * H, :A] = wa2 - wa2.mean(axis=1, keepdims=True)
    b[2, :A] = ba2 - ba2.mean() + bv2

    return jnp.asarray(w, jnp.bfloat16), jnp.asarray(b, jnp.float32)


# ----------------------------------------------------------------------------
# References
# ----------------------------------------------------------------------------
def qnetwork_reference_f32(state, p):
    x = jnp.maximum(state @ p["w1"] + p["b1"], 0.0)
    v = jnp.maximum(x @ p["wv1"] + p["bv1"], 0.0) @ p["wv2"] + p["bv2"]
    a = jnp.maximum(x @ p["wa1"] + p["ba1"], 0.0) @ p["wa2"] + p["ba2"]
    return v + a - jnp.mean(a, axis=1, keepdims=True)


def qnetwork_reference_bf16(state, p):
    """Same precision regime as the kernel: bf16 matmul operands, f32 accum."""
    def dot(a, b):
        return jnp.dot(a.astype(jnp.bfloat16), b.astype(jnp.bfloat16),
                       preferred_element_type=jnp.float32)
    x = jnp.maximum(dot(state, p["w1"]) + p["b1"], 0.0)
    vh = jnp.maximum(dot(x, p["wv1"]) + p["bv1"], 0.0)
    ah = jnp.maximum(dot(x, p["wa1"]) + p["ba1"], 0.0)
    v = dot(vh, p["wv2"]) + p["bv2"]
    a = dot(ah, p["wa2"]) + p["ba2"]
    return v + a - jnp.mean(a, axis=1, keepdims=True)


# ----------------------------------------------------------------------------
if __name__ == "__main__":
    batch, state_size, action_size, hidden_size = 2, 8, 4, 64

    key = jax.random.PRNGKey(0)
    k_state, k_params = jax.random.split(key)
    state = jax.random.normal(k_state, (batch, state_size), jnp.float32)
    params = init_params(k_params, state_size, action_size, hidden_size)
    w_slab, b_slab = pack_params(params, state_size, action_size, hidden_size)

    q = qnetwork_forward(state, w_slab, b_slab, action_size)
    q = jax.block_until_ready(q)
    q_f32 = np.asarray(q).astype(np.float32)

    # Precision-matched (bf16-operand) reference; kernel additionally folds
    # the dueling combine into bf16 weights and stores bf16 -> allow ~1e-2.
    q_ref_bf16 = np.asarray(qnetwork_reference_bf16(state, params))
    np.testing.assert_allclose(q_f32, q_ref_bf16, rtol=1e-2, atol=1e-2)

    # Loose check vs the full-f32 PyTorch-semantics reference.
    q_ref_f32 = np.asarray(qnetwork_reference_f32(state, params))
    np.testing.assert_allclose(q_f32, q_ref_f32, rtol=5e-2, atol=5e-2)

    print("KERNEL_OK")
</pallas_src>

<mosaic_0001>
module attributes {stable_mosaic.version = 11 : i64} {
  func.func @_qnet_kernel(%arg0: i32, %arg1: memref<2x16xf32, #tpu.memory_space<vmem>>, %arg2: memref<3x128x128xbf16, #tpu.memory_space<vmem>>, %arg3: memref<3x128xf32, #tpu.memory_space<vmem>>, %arg4: memref<2x128xbf16, #tpu.memory_space<vmem>>) attributes {dimension_semantics = [#tpu.dimension_semantics<parallel>], iteration_bounds = array<i64: 1>, scalar_prefetch = 0 : i64, scratch_operands = 0 : i64, tpu.core_type = #tpu.core_type<tc>, window_params = [{transform_indices = @transform_0, window_bounds = array<i64: 2, 16>}, {pipeline_mode = #tpu.pipeline_mode<synchronous>, transform_indices = @transform_1, window_bounds = array<i64: 3, 128, 128>}, {pipeline_mode = #tpu.pipeline_mode<synchronous>, transform_indices = @transform_2, window_bounds = array<i64: 3, 128>}, {transform_indices = @transform_3, window_bounds = array<i64: 2, 128>}]} {
    %c0 = arith.constant 0 : index
    %c0_0 = arith.constant 0 : index
    %0 = vector.load %arg1[%c0, %c0_0] : memref<2x16xf32, #tpu.memory_space<vmem>>, vector<2x16xf32>
    %1 = arith.truncf %0 : vector<2x16xf32> to vector<2x16xbf16>
    %c0_1 = arith.constant 0 : index
    %c0_2 = arith.constant 0 : index
    %c0_3 = arith.constant 0 : index
    %2 = vector.load %arg2[%c0_1, %c0_2, %c0_3] : memref<3x128x128xbf16, #tpu.memory_space<vmem>>, vector<1x16x128xbf16>
    %3 = vector.shape_cast %2 : vector<1x16x128xbf16> to vector<16x128xbf16>
    %cst = arith.constant dense<0.000000e+00> : vector<2x128xf32>
    %4 = tpu.matmul %1, %3, %cst {dimension_numbers = #tpu.dot_dimension_numbers<[1], [0], [0], [1], [0, 0, 1, 1], [], []>} : vector<2x16xbf16>, vector<16x128xbf16>, vector<2x128xf32> -> vector<2x128xf32>
    %c0_4 = arith.constant 0 : index
    %c0_5 = arith.constant 0 : index
    %5 = vector.load %arg3[%c0_4, %c0_5] : memref<3x128xf32, #tpu.memory_space<vmem>>, vector<1x128xf32>
    %6 = vector.broadcast %5 : vector<1x128xf32> to vector<2x128xf32>
    %7 = arith.addf %4, %6 : vector<2x128xf32>
    %cst_6 = arith.constant 0.000000e+00 : f32
    %8 = vector.broadcast %cst_6 : f32 to vector<2x128xf32>
    %9 = arith.maximumf %7, %8 : vector<2x128xf32>
    %10 = arith.truncf %9 : vector<2x128xf32> to vector<2x128xbf16>
    %c1 = arith.constant 1 : index
    %c0_7 = arith.constant 0 : index
    %c0_8 = arith.constant 0 : index
    %11 = vector.load %arg2[%c1, %c0_7, %c0_8] : memref<3x128x128xbf16, #tpu.memory_space<vmem>>, vector<1x128x128xbf16>
    %12 = vector.shape_cast %11 : vector<1x128x128xbf16> to vector<128x128xbf16>
    %cst_9 = arith.constant dense<0.000000e+00> : vector<2x128xf32>
    %13 = tpu.matmul %10, %12, %cst_9 {dimension_numbers = #tpu.dot_dimension_numbers<[1], [0], [0], [1], [0, 0, 1, 1], [], []>} : vector<2x128xbf16>, vector<128x128xbf16>, vector<2x128xf32> -> vector<2x128xf32>
    %c1_10 = arith.constant 1 : index
    %c0_11 = arith.constant 0 : index
    %14 = vector.load %arg3[%c1_10, %c0_11] : memref<3x128xf32, #tpu.memory_space<vmem>>, vector<1x128xf32>
    %15 = vector.broadcast %14 : vector<1x128xf32> to vector<2x128xf32>
    %16 = arith.addf %13, %15 : vector<2x128xf32>
    %cst_12 = arith.constant 0.000000e+00 : f32
    %17 = vector.broadcast %cst_12 : f32 to vector<2x128xf32>
    %18 = arith.maximumf %16, %17 : vector<2x128xf32>
    %19 = arith.truncf %18 : vector<2x128xf32> to vector<2x128xbf16>
    %c2 = arith.constant 2 : index
    %c0_13 = arith.constant 0 : index
    %c0_14 = arith.constant 0 : index
    %20 = vector.load %arg2[%c2, %c0_13, %c0_14] : memref<3x128x128xbf16, #tpu.memory_space<vmem>>, vector<1x128x128xbf16>
    %21 = vector.shape_cast %20 : vector<1x128x128xbf16> to vector<128x128xbf16>
    %cst_15 = arith.constant dense<0.000000e+00> : vector<2x128xf32>
    %22 = tpu.matmul %19, %21, %cst_15 {dimension_numbers = #tpu.dot_dimension_numbers<[1], [0], [0], [1], [0, 0, 1, 1], [], []>} : vector<2x128xbf16>, vector<128x128xbf16>, vector<2x128xf32> -> vector<2x128xf32>
    %c2_16 = arith.constant 2 : index
    %c0_17 = arith.constant 0 : index
    %23 = vector.load %arg3[%c2_16, %c0_17] : memref<3x128xf32, #tpu.memory_space<vmem>>, vector<1x128xf32>
    %24 = vector.broadcast %23 : vector<1x128xf32> to vector<2x128xf32>
    %25 = arith.addf %22, %24 : vector<2x128xf32>
    %26 = arith.truncf %25 : vector<2x128xf32> to vector<2x128xbf16>
    %c0_18 = arith.constant 0 : index
    %c0_19 = arith.constant 0 : index
    %27 = vector.load %arg4[%c0_18, %c0_19] : memref<2x128xbf16, #tpu.memory_space<vmem>>, vector<2x128xbf16>
    tpu.vector_store %arg4[%c0_18, %c0_19], %26 {strides = array<i32>} : memref<2x128xbf16, #tpu.memory_space<vmem>>, vector<2x128xbf16>,
    return
  }
  func.func @transform_0(%arg0: i32) -> (i32, i32) {
    %c0_i32 = arith.constant 0 : i32
    %c0_i32_0 = arith.constant 0 : i32
    return %arg0, %c0_i32 : i32, i32
  }
  func.func @transform_1(%arg0: i32) -> (i32, i32, i32) {
    %c0_i32 = arith.constant 0 : i32
    %c0_i32_0 = arith.constant 0 : i32
    %c0_i32_1 = arith.constant 0 : i32
    %c0_i32_2 = arith.constant 0 : i32
    return %c0_i32, %c0_i32_0, %c0_i32_1 : i32, i32, i32
  }
  func.func @transform_2(%arg0: i32) -> (i32, i32) {
    %c0_i32 = arith.constant 0 : i32
    %c0_i32_0 = arith.constant 0 : i32
    %c0_i32_1 = arith.constant 0 : i32
    return %c0_i32, %c0_i32_0 : i32, i32
  }
  func.func @transform_3(%arg0: i32) -> (i32, i32) {
    %c0_i32 = arith.constant 0 : i32
    %c0_i32_0 = arith.constant 0 : i32
    return %arg0, %c0_i32 : i32, i32
  }
}

</mosaic_0001>

<bundles_post_ra>
// kernel: tpu_custom_call.1
= control target key start
LH: loop header
LB: loop body
LE: loop exit
PB: predicated region body
PF: predicated region fallthrough
CT: control target
= control target key end

     0   :  { %8 = vsyncpa [#allocation3], 0  ;;  %s612_s0 = inlined_call_operand.hbm [shape: f32[2,16], index: 0, kind: input, shape index: {}]   ;;  %s613_s1 = inlined_call_operand.hbm [shape: bf16[3,128,128], index: 1, kind: input, shape index: {}]   ;;  %s614_s2 = inlined_call_operand.hbm [shape: f32[3,128], index: 2, kind: input, shape index: {}]   ;;  %s615_s3 = inlined_call_operand.hbm [shape: bf16[2,128], index: 3, kind: output, shape index: {}]  }
   0x1   :  { %9 = vsyncpa [#allocation6], 0 }
   0x2   :  { %10 = vsyncpa [#allocation4], 0  ;;  %s552_s12 = smov [#allocation5]  }
   0x3   :  { %s26_s13 = sshll.u32 %s552_s12, 4  ;;  %s27_s13 = int_to_ptr.vmem [resolvable:$true] %s26_s13 }
   0x4   :  { %s474_s14 = scalar_lea.vmem %s27_s13, 3072  ;;  %p479_p1 = scmp.lt.s32.totalorder %s27_s13, %s27_s13 }
   0x5   :  { %p475_p0 = scmp.ne.s32.totalorder %s27_s13, %s474_s14  ;;  %p480_p2 = scmp.lt.s32.totalorder %s474_s14, %s474_s14 }
   0x7   :  { %p481_p3 = por %p480_p2, %p479_p1 }
   0x9   :  { %p482_p4 = pnand %p481_p3, %p475_p0 }
   0xb   :  { %485 = shalt.err (!%p482_p4)
}
   0xc   :  { %s553_s15 = smov 64   ;;  %s554_s16 = smov 4  }
   0xd   :  { %32 = dma.hbm_to_vmem [thread:$0]  %s613_s1, 3072, %s27_s13, [#allocation6], %s553_s15, %s553_s15, %s554_s16  }
   0xe   :  { %s555_s19 = smov [#allocation2]   ;;  %s556_s21 = smov [#allocation7]  }
   0xf   :  { %s17_s20 = sshll.u32 %s555_s19, 4  ;;  %s39_s22 = sshll.u32 %s556_s21, 4  ;;  %s18_s20 = int_to_ptr.vmem [resolvable:$true] %s17_s20  ;;  %s40_s22 = int_to_ptr.vmem [resolvable:$true] %s39_s22 }
  0x10   :  { %s494_s23 = scalar_lea.vmem %s18_s20, 32  ;;  %p499_p6 = scmp.lt.s32.totalorder %s18_s20, %s18_s20 }
  0x11   :  { %p495_p5 = scmp.ne.s32.totalorder %s18_s20, %s494_s23  ;;  %p500_p7 = scmp.lt.s32.totalorder %s494_s23, %s494_s23 }
  0x13   :  { %p501_p8 = por %p500_p7, %p499_p6 }
  0x15   :  { %p502_p9 = pnand %p501_p8, %p495_p5 }
  0x17   :  { %505 = shalt.err (!%p502_p9)
}
  0x18   :  { %20 = dma.hbm_to_vmem [thread:$0]  %s612_s0, 32, %s18_s20, [#allocation3]  }
  0x19   :  { %s514_s26 = scalar_lea.vmem %s40_s22, 64  ;;  %p519_p11 = scmp.lt.s32.totalorder %s40_s22, %s40_s22 }
  0x1a   :  { %p515_p10 = scmp.ne.s32.totalorder %s40_s22, %s514_s26  ;;  %p520_p12 = scmp.lt.s32.totalorder %s514_s26, %s514_s26 }
  0x1c   :  { %p521_p13 = por %p520_p12, %p519_p11 }
  0x1e   :  { %p522_p0 = pnand %p521_p13, %p515_p10 }
  0x20   :  { %525 = shalt.err (!%p522_p0)
}
  0x21   :  { %42 = dma.hbm_to_vmem [thread:$0]  %s614_s2, 64, %s40_s22, [#allocation6]  }
  0x22   :  { %546 = dma.done.wait [#allocation3], 32  }
  0x23   :  { %547 = vsyncadd [#allocation3], 4294967264 }
  0x24   :  { %548 = dma.done.wait [#allocation6], 3136  }
  0x25   :  { %549 = vsyncadd [#allocation6], 4294964160  ;;  %v557_v0 = vmov 0.0   ;;  %vm558_vm0 = vmmov 0   ;;  %v449_v1 = vld [vmem:[#allocation5] sm:$0xff]   ;;  %vm68_vm1 = vcmask 130048  }
  0x26   :  { %395 = vmatprep.subr.bf16.mxu0 %v557_v0  ;;  %397 = vmatprep.mubr.msk.bf16.mxu0 %vm558_vm0, %v557_v0  ;;  %v53_v2 = vld [vmem:[#allocation2] sm:$0x3]  ;;  %v451_v5 = vld [vmem:[#allocation5 + $0x70] sm:$0xff]   ;;  %v452_v6 = vld [vmem:[#allocation5 + $0x68] sm:$0xff]   ;;  %s559_s0 = smov [#allocation8]  }
  0x27   :  { %401 = vmatprep.subr.bf16.mxu1 %v557_v0  ;;  %417 = vmatprep.mubr.msk.bf16.mxu1 %vm558_vm0, %v557_v0  ;;  %v54_v3 = vpack.c.bf16 %v53_v2, %v53_v2  ;;  %v450_v4 = vld [vmem:[#allocation5 + $0x78] sm:$0xff]   ;;  %v453_v7 = vld [vmem:[#allocation5 + $0x60] sm:$0xff]   ;;  %v455_v9 = vld [vmem:[#allocation5 + $0x50] sm:$0xff]   ;;  %s344_s2 = sshll.u32 %s559_s0, 4  ;;  %s345_s2 = int_to_ptr.vmem [resolvable:$true] %s344_s2 }
  0x28   :  { %396 = vmatpush3.bf16.msra.mxu0 %v449_v1  ;;  %402 = vmatpush3.bf16.msra.mxu1 %v450_v4  ;;  %v454_v8 = vld [vmem:[#allocation5 + $0x58] sm:$0xff]   ;;  %v456_v10 = vld [vmem:[#allocation5 + $0x48] sm:$0xff]   ;;  %v457_v11 = vld [vmem:[#allocation5 + $0x40] sm:$0xff]   ;;  %s526_s28 = scalar_lea.vmem %s345_s2, 16  ;;  %s530_s29 = scalar_lea.vmem %s345_s2, 32 }
  0x29   :  { %421 = vmatprep.subr.bf16.mxu0 %v557_v0  ;;  %403 = vmatprep.subr.bf16.mxu1 %v557_v0  ;;  %v458_v12 = vld [vmem:[#allocation5 + $0xb8] sm:$0xff]   ;;  %v459_v13 = vld [vmem:[#allocation5 + $0xb0] sm:$0xff]   ;;  %v460_v14 = vld [vmem:[#allocation5 + $0xa8] sm:$0xff]   ;;  %p527_p1 = scmp.ne.s32.totalorder %s345_s2, %s526_s28  ;;  %p531_p2 = scmp.lt.s32.totalorder %s345_s2, %s345_s2 }
  0x2a   :  { %v461_v15 = vld [vmem:[#allocation5 + $0xa0] sm:$0xff]   ;;  %v462_v16 = vld [vmem:[#allocation5 + $0x98] sm:$0xff]   ;;  %v463_v17 = vld [vmem:[#allocation5 + $0x90] sm:$0xff]   ;;  %p532_p3 = scmp.lt.s32.totalorder %s530_s29, %s526_s28 }
  0x2b   :  { %398 = vmatmul.mubr.msk.bf16.vlgmr.msra.gmra.mxu0 %vm68_vm1, %v54_v3  ;;  %v354_v18 = vld [vmem:[#allocation7] ss:$0 sm:$0xff]  ;;  %v464_v26 = vld [vmem:[#allocation5 + $0x88] sm:$0xff]   ;;  %v357_v28 = vld [vmem:[#allocation7 + $0x1] ss:$0 sm:$0xff] }
  0x2c   :  { %437 = vmatprep.mubr.msk.bf16.mxu0 %vm558_vm0, %v557_v0  ;;  %404 = vmatpush3.bf16.msra.mxu1 %v451_v5  ;;  %v465_v27 = vld [vmem:[#allocation5 + $0x80] sm:$0xff]   ;;  %p533_p4 = por %p532_p3, %p531_p2 }
  0x2d   :  { %405 = vmatprep.subr.bf16.mxu1 %v557_v0  ;;  %422 = vmatpush3.bf16.msra.mxu0 %v458_v12  ;;  %v366_v36 = vld [vmem:[#allocation7 + $0x2] ss:$0 sm:$0xff] }
  0x2e   :  { %423 = vmatprep.subr.bf16.mxu0 %v557_v0  ;;  %p534_p5 = pnand %p533_p4, %p527_p1 }
  0x30   :  { %406 = vmatpush3.bf16.msra.mxu1 %v452_v6 }
  0x31   :  { %407 = vmatprep.subr.bf16.mxu1 %v557_v0  ;;  %424 = vmatpush3.bf16.msra.mxu0 %v459_v13 }
  0x32   :  { %425 = vmatprep.subr.bf16.mxu0 %v557_v0 }
  0x34   :  { %408 = vmatpush3.bf16.msra.mxu1 %v453_v7 }
  0x35   :  { %409 = vmatprep.subr.bf16.mxu1 %v557_v0  ;;  %426 = vmatpush3.bf16.msra.mxu0 %v460_v14 }
  0x36   :  { %427 = vmatprep.subr.bf16.mxu0 %v557_v0 }
  0x38   :  { %410 = vmatpush3.bf16.msra.mxu1 %v454_v8 }
  0x39   :  { %411 = vmatprep.subr.bf16.mxu1 %v557_v0  ;;  %428 = vmatpush3.bf16.msra.mxu0 %v461_v15 }
  0x3a   :  { %429 = vmatprep.subr.bf16.mxu0 %v557_v0 }
  0x3c   :  { %412 = vmatpush3.bf16.msra.mxu1 %v455_v9 }
  0x3d   :  { %413 = vmatprep.subr.bf16.mxu1 %v557_v0  ;;  %430 = vmatpush3.bf16.msra.mxu0 %v462_v16 }
  0x3e   :  { %431 = vmatprep.subr.bf16.mxu0 %v557_v0 }
  0x40   :  { %414 = vmatpush3.bf16.msra.mxu1 %v456_v10 }
  0x41   :  { %415 = vmatprep.subr.bf16.mxu1 %v557_v0  ;;  %432 = vmatpush3.bf16.msra.mxu0 %v463_v17 }
  0x42   :  { %433 = vmatprep.subr.bf16.mxu0 %v557_v0 }
  0x44   :  { %416 = vmatpush3.bf16.msra.mxu1 %v457_v11 }
  0x45   :  { %434 = vmatpush3.bf16.msra.mxu0 %v464_v26 }
  0x46   :  { %435 = vmatprep.subr.bf16.mxu0 %v557_v0 }
  0x49   :  { %436 = vmatpush3.bf16.msra.mxu0 %v465_v27 }
  0xeb   :  { %v106_v19 = vpop.f32.mrf.mxu0 }
  0xec   :  { %v107_v20 = vadd.f32 %v354_v18, %v106_v19 }
  0xed   :  { %v399_v21 = vpop.f32.mrf.mxu0 }
  0xee   :  { %v112_v22 = vmax.f32 %v107_v20, 0.0 }
  0xef   :  { %v109_v23 = vpop.f32.mrf.mxu0 }
  0xf0   :  { %v113_v24 = vpack.c.bf16 %v112_v22, %v112_v22 }
  0xf1   :  { %v400_v25 = vpop.f32.mrf.mxu0 }
  0xf2   :  { %418 = vmatmul.mubr.bf16.vlgmr.msra.gmra.mxu1 %v113_v24 }
 0x1b2   :  { %v218_v29 = vpop.f32.mrf.mxu1 }
 0x1b3   :  { %v219_v30 = vadd.f32 %v357_v28, %v218_v29 }
 0x1b4   :  { %v419_v31 = vpop.f32.mrf.mxu1 }
 0x1b5   :  { %v224_v32 = vmax.f32 %v219_v30, 0.0 }
 0x1b6   :  { %v221_v33 = vpop.f32.mrf.mxu1 }
 0x1b7   :  { %v225_v34 = vpack.c.bf16 %v224_v32, %v224_v32 }
 0x1b8   :  { %v420_v35 = vpop.f32.mrf.mxu1 }
 0x1b9   :  { %438 = vmatmul.mubr.bf16.vlgmr.msra.gmra.mxu0 %v225_v34 }
 0x279   :  { %v330_v37 = vpop.f32.mrf.mxu0 }
 0x27a   :  { %v331_v38 = vadd.f32 %v366_v36, %v330_v37 }
 0x27b   :  { %v439_v39 = vpop.f32.mrf.mxu0 }
 0x27c   :  { %v336_v40 = vpack.c.bf16 %v331_v38, %v331_v38 }
 0x27d   :  { %v333_v41 = vpop.f32.mrf.mxu0 }
 0x27e   :  { %337 = vst [vmem:[#allocation8] sm:$0x1] %v336_v40 }
 0x27f   :  { %v440_v42 = vpop.f32.mrf.mxu0 }
 0x280   :  { %537 = shalt.err (!%p534_p5)
}
 0x281   :  { %347 = dma.vmem_to_hbm [thread:$0]  %s345_s2, 16, %s615_s3, [#allocation4]  }
 0x282   :  { %550 = dma.done.wait [#allocation4], 16  }
 0x283   :  { %551 = vsyncadd [#allocation4], 4294967280 }
 0x284   :  { %351 = vsyncpa [#allocation3], 1 }
 0x285   :  { %352 = vsyncpa [#allocation6], 1 }
 0x286   :  { %353 = vsyncpa [#allocation4], 1 }

</bundles_post_ra>
